<compile_context>
chip_gen: v7x
topology: tpu7x:2x2x1
jax: 0.10.0
libtpu: 0.0.40
codegen_flags: <defaults>
</compile_context>

<pallas_src>
import functools

import jax
import jax.numpy as jnp
from jax.experimental import pallas as pl
from jax.experimental.pallas import tpu as pltpu

_LANES = 128   # TPU lane width
_SUB = 8       # f32 sublanes per vreg tile


def _thrreg_kernel(x_ref, o_ref, acc_ref, *, block_rows, blocks_per_core, rows):
    """Per-core partial sum of x*(1-x), accumulated into an (8, 128) vreg tile."""
    c = pl.program_id(0)      # core-split axis
    i = pl.program_id(1)      # streaming / reduction axis (arbitrary)

    @pl.when(i == 0)
    def _():
        acc_ref[...] = jnp.zeros_like(acc_ref)

    groups = block_rows // _SUB
    row0 = (c * blocks_per_core + i) * block_rows
    is_full = row0 + block_rows <= rows
    is_partial = jnp.logical_and(row0 < rows, jnp.logical_not(is_full))

    # Interior blocks: no mask work at all (saves iota + compare + select per vreg).
    @pl.when(is_full)
    def _():
        x = x_ref[...].astype(jnp.float32)
        val = x * (1.0 - x)   # == (1 - (x^2 + (x-1)^2)) / 2 ; *2 folded in wrapper
        acc_ref[...] += val.reshape(groups, _SUB, _LANES).sum(axis=0)

    # At most one partial block per core; phantom blocks (row0 >= rows) do no work.
    @pl.when(is_partial)
    def _():
        x = x_ref[...].astype(jnp.float32)
        val = x * (1.0 - x)
        gid = row0 + jax.lax.broadcasted_iota(jnp.int32, val.shape, 0)
        val = jnp.where(gid < rows, val, 0.0)   # select: NaN/Inf-safe for OOB rows
        acc_ref[...] += val.reshape(groups, _SUB, _LANES).sum(axis=0)

    @pl.when(i == pl.num_programs(1) - 1)
    def _():
        o_ref[...] = acc_ref[...]


def _tpu_generation():
    """Best-effort TPU generation detection (0 if unknown)."""
    try:
        kind = jax.devices()[0].device_kind.lower()
    except Exception:
        return 0
    for g in (7, 6, 5, 4):
        if f"v{g}" in kind:
            return g
    return 0


def thrreg_loss(pred):
    """Pallas implementation of ThrReg_loss.forward(pred)."""
    x = pred.reshape(-1)
    n = x.size
    itemsize = jnp.dtype(x.dtype).itemsize
    sub = _SUB * max(1, 4 // itemsize)   # sublane multiple (f32 -> 8, bf16 -> 16)

    rows = n // _LANES
    rem = n - rows * _LANES

    if rows < sub:
        # Tiny input: not worth a kernel launch.
        p = x.astype(jnp.float32)
        return (jnp.float32(2.0) / n) * jnp.sum(p * (1.0 - p))

    # Lane-dense main slab; the flat tail (< 128 elems) is summed in plain JAX,
    # so no full-array pad/copy is ever materialized.
    x2 = x[: rows * _LANES].reshape(rows, _LANES)

    gen = _tpu_generation()
    # Generation-sized streaming blocks (f32 bytes/block: 4 MiB / 2 MiB / 1 MiB).
    # Double-buffered input + (8,128) acc stays well under default scoped VMEM
    # on every generation (<= 8 MiB on v7x, <= 2 MiB on v5e).
    max_rows = {7: 8192, 6: 4096, 5: 2048}.get(gen, 2048)
    num_cores = 2 if gen >= 7 else 1     # 2 TCs/chip on v7x, 1 on v5e/v6e

    block_rows = min(max_rows, (rows // sub) * sub)
    num_blocks = pl.cdiv(rows, block_rows)
    blocks_per_core = pl.cdiv(num_blocks, num_cores)

    def in_map(c, i):
        # Clamp so phantom blocks never index past the array; their contribution
        # is skipped by the in-kernel pl.when(row0 < rows) gating anyway.
        return (jnp.minimum(c * blocks_per_core + i, num_blocks - 1), 0)

    def run(dim_sem):
        return pl.pallas_call(
            functools.partial(_thrreg_kernel, block_rows=block_rows,
                              blocks_per_core=blocks_per_core, rows=rows),
            out_shape=jax.ShapeDtypeStruct((num_cores, _SUB, _LANES), jnp.float32),
            grid_spec=pltpu.PrefetchScalarGridSpec(
                num_scalar_prefetch=0,
                grid=(num_cores, blocks_per_core),
                in_specs=[pl.BlockSpec((block_rows, _LANES), in_map)],
                out_specs=pl.BlockSpec((None, _SUB, _LANES),
                                       lambda c, i: (c, 0, 0)),
                scratch_shapes=[pltpu.VMEM((_SUB, _LANES), jnp.float32)],
            ),
            compiler_params=pltpu.CompilerParams(dimension_semantics=dim_sem),
            cost_estimate=pl.CostEstimate(
                flops=2 * n, transcendentals=0,
                bytes_accessed=rows * _LANES * itemsize),
        )(x2)

    if num_cores > 1:
        # Engage both TensorCores on v7x; fall back if CORE_PARALLEL is rejected.
        core_sem = getattr(pltpu, "CORE_PARALLEL", "parallel")
        arb_sem = getattr(pltpu, "ARBITRARY", "arbitrary")
        try:
            partials = run((core_sem, arb_sem))
        except Exception:
            partials = run(("parallel", "arbitrary"))
    else:
        partials = run(("parallel", "arbitrary"))

    total = jnp.sum(partials)                      # (cores, 8, 128) -> scalar, tiny
    if rem:
        t = x[rows * _LANES:].astype(jnp.float32)
        total = total + jnp.sum(t * (1.0 - t))
    return (jnp.float32(2.0) / n) * total


def _reference(pred):
    p = pred.astype(jnp.float32)
    return jnp.mean(1.0 - ((p - 0.0) ** 2 + (p - 1.0) ** 2))


if __name__ == "__main__":
    key = jax.random.PRNGKey(0)
    # Shapes consistent with a segmentation "pred" map: N, C, H, W
    pred = jax.random.uniform(key, (2, 4, 16, 16), dtype=jnp.float32)

    loss = thrreg_loss(pred)
    jax.block_until_ready(loss)

    ref = _reference(pred)
    assert jnp.allclose(loss, ref, atol=1e-5, rtol=1e-5), (loss, ref)
    print("KERNEL_OK")
</pallas_src>

<mosaic_0001>
module attributes {stable_mosaic.version = 11 : i64} {
  func.func @_thrreg_kernel(%arg0: i32, %arg1: i32, %arg2: memref<16x128xf32, #tpu.memory_space<vmem>>, %arg3: memref<1x8x128xf32, #tpu.memory_space<vmem>>, %arg4: memref<8x128xf32, #tpu.memory_space<vmem>>) attributes {dimension_semantics = [#tpu.dimension_semantics<parallel>, #tpu.dimension_semantics<arbitrary>], iteration_bounds = array<i64: 1, 1>, scalar_prefetch = 0 : i64, scratch_operands = 1 : i64, tpu.core_type = #tpu.core_type<tc>, window_params = [{transform_indices = @transform_0, window_bounds = array<i64: 16, 128>}, {transform_indices = @transform_1, window_bounds = array<i64: 1, 8, 128>}]} {
    %c0_i32 = arith.constant 0 : i32
    %0 = arith.cmpi eq, %arg1, %c0_i32 : i32
    %1 = arith.extui %0 : i1 to i32
    %c0_i32_0 = arith.constant 0 : i32
    %2 = arith.cmpi ne, %1, %c0_i32_0 : i32
    scf.if %2 {
      %cst = arith.constant 0.000000e+00 : f32
      %18 = vector.broadcast %cst : f32 to vector<8x128xf32>
      %c0 = arith.constant 0 : index
      %c0_8 = arith.constant 0 : index
      %19 = vector.load %arg4[%c0, %c0_8] : memref<8x128xf32, #tpu.memory_space<vmem>>, vector<8x128xf32>
      tpu.vector_store %arg4[%c0, %c0_8], %18 {strides = array<i32>} : memref<8x128xf32, #tpu.memory_space<vmem>>, vector<8x128xf32>,
    } else {
    }
    %c1_i32 = arith.constant 1 : i32
    %3 = arith.muli %arg0, %c1_i32 : i32
    %4 = arith.addi %3, %arg1 : i32
    %c16_i32 = arith.constant 16 : i32
    %5 = arith.muli %4, %c16_i32 : i32
    %c16_i32_1 = arith.constant 16 : i32
    %6 = arith.addi %5, %c16_i32_1 : i32
    %c16_i32_2 = arith.constant 16 : i32
    %7 = arith.cmpi sle, %6, %c16_i32_2 : i32
    %c16_i32_3 = arith.constant 16 : i32
    %8 = arith.cmpi slt, %5, %c16_i32_3 : i32
    %true = arith.constant true
    %9 = arith.xori %7, %true : i1
    %10 = arith.andi %8, %9 : i1
    %11 = arith.extui %7 : i1 to i32
    %c0_i32_4 = arith.constant 0 : i32
    %12 = arith.cmpi ne, %11, %c0_i32_4 : i32
    scf.if %12 {
      %c0 = arith.constant 0 : index
      %c0_8 = arith.constant 0 : index
      %18 = vector.load %arg2[%c0, %c0_8] : memref<16x128xf32, #tpu.memory_space<vmem>>, vector<16x128xf32>
      %cst = arith.constant 1.000000e+00 : f32
      %19 = vector.broadcast %cst : f32 to vector<16x128xf32>
      %20 = arith.subf %19, %18 : vector<16x128xf32>
      %21 = arith.mulf %18, %20 : vector<16x128xf32>
      %c0_9 = arith.constant 0 : index
      %c0_10 = arith.constant 0 : index
      %22 = vector.load %arg4[%c0_9, %c0_10] : memref<8x128xf32, #tpu.memory_space<vmem>>, vector<8x128xf32>
      %23 = vector.shape_cast %21 : vector<16x128xf32> to vector<2x8x128xf32>
      %cst_11 = arith.constant dense<0.000000e+00> : vector<8x128xf32>
      %24 = vector.multi_reduction <add>, %23, %cst_11 [0] : vector<2x8x128xf32> to vector<8x128xf32>
      %25 = arith.addf %22, %24 : vector<8x128xf32>
      %c0_12 = arith.constant 0 : index
      %c0_13 = arith.constant 0 : index
      %26 = vector.load %arg4[%c0_12, %c0_13] : memref<8x128xf32, #tpu.memory_space<vmem>>, vector<8x128xf32>
      tpu.vector_store %arg4[%c0_12, %c0_13], %25 {strides = array<i32>} : memref<8x128xf32, #tpu.memory_space<vmem>>, vector<8x128xf32>,
    } else {
    }
    %13 = arith.extui %10 : i1 to i32
    %c0_i32_5 = arith.constant 0 : i32
    %14 = arith.cmpi ne, %13, %c0_i32_5 : i32
    scf.if %14 {
      %c0 = arith.constant 0 : index
      %c0_8 = arith.constant 0 : index
      %18 = vector.load %arg2[%c0, %c0_8] : memref<16x128xf32, #tpu.memory_space<vmem>>, vector<16x128xf32>
      %cst = arith.constant 1.000000e+00 : f32
      %19 = vector.broadcast %cst : f32 to vector<16x128xf32>
      %20 = arith.subf %19, %18 : vector<16x128xf32>
      %21 = arith.mulf %18, %20 : vector<16x128xf32>
      %22 = tpu.iota {dimensions = array<i32: 0>} : vector<16x128xi32>
      %23 = vector.broadcast %5 : i32 to vector<16x128xi32>
      %24 = arith.addi %23, %22 : vector<16x128xi32>
      %c16_i32_9 = arith.constant 16 : i32
      %25 = vector.broadcast %c16_i32_9 : i32 to vector<16x128xi32>
      %26 = arith.cmpi slt, %24, %25 : vector<16x128xi32>
      %cst_10 = arith.constant 0.000000e+00 : f32
      %27 = vector.broadcast %cst_10 : f32 to vector<16x128xf32>
      %28 = arith.select %26, %21, %27 : vector<16x128xi1>, vector<16x128xf32>
      %c0_11 = arith.constant 0 : index
      %c0_12 = arith.constant 0 : index
      %29 = vector.load %arg4[%c0_11, %c0_12] : memref<8x128xf32, #tpu.memory_space<vmem>>, vector<8x128xf32>
      %30 = vector.shape_cast %28 : vector<16x128xf32> to vector<2x8x128xf32>
      %cst_13 = arith.constant dense<0.000000e+00> : vector<8x128xf32>
      %31 = vector.multi_reduction <add>, %30, %cst_13 [0] : vector<2x8x128xf32> to vector<8x128xf32>
      %32 = arith.addf %29, %31 : vector<8x128xf32>
      %c0_14 = arith.constant 0 : index
      %c0_15 = arith.constant 0 : index
      %33 = vector.load %arg4[%c0_14, %c0_15] : memref<8x128xf32, #tpu.memory_space<vmem>>, vector<8x128xf32>
      tpu.vector_store %arg4[%c0_14, %c0_15], %32 {strides = array<i32>} : memref<8x128xf32, #tpu.memory_space<vmem>>, vector<8x128xf32>,
    } else {
    }
    %c0_i32_6 = arith.constant 0 : i32
    %15 = arith.cmpi eq, %arg1, %c0_i32_6 : i32
    %16 = arith.extui %15 : i1 to i32
    %c0_i32_7 = arith.constant 0 : i32
    %17 = arith.cmpi ne, %16, %c0_i32_7 : i32
    scf.if %17 {
      %c0 = arith.constant 0 : index
      %c0_8 = arith.constant 0 : index
      %18 = vector.load %arg4[%c0, %c0_8] : memref<8x128xf32, #tpu.memory_space<vmem>>, vector<8x128xf32>
      %c0_9 = arith.constant 0 : index
      %c0_10 = arith.constant 0 : index
      %c0_11 = arith.constant 0 : index
      %19 = vector.load %arg3[%c0_9, %c0_10, %c0_11] : memref<1x8x128xf32, #tpu.memory_space<vmem>>, vector<1x8x128xf32>
      %20 = vector.shape_cast %19 : vector<1x8x128xf32> to vector<8x128xf32>
      %21 = vector.shape_cast %18 : vector<8x128xf32> to vector<1x8x128xf32>
      tpu.vector_store %arg3[%c0_9, %c0_10, %c0_11], %21 {strides = array<i32>} : memref<1x8x128xf32, #tpu.memory_space<vmem>>, vector<1x8x128xf32>,
    } else {
    }
    return
  }
  func.func @transform_0(%arg0: i32, %arg1: i32) -> (i32, i32) {
    %c1_i32 = arith.constant 1 : i32
    %0 = arith.muli %arg0, %c1_i32 : i32
    %1 = arith.addi %0, %arg1 : i32
    %c0_i32 = arith.constant 0 : i32
    %2 = arith.minsi %1, %c0_i32 : i32
    %c0_i32_0 = arith.constant 0 : i32
    %c0_i32_1 = arith.constant 0 : i32
    return %2, %c0_i32_0 : i32, i32
  }
  func.func @transform_1(%arg0: i32, %arg1: i32) -> (i32, i32, i32) {
    %c0_i32 = arith.constant 0 : i32
    %c0_i32_0 = arith.constant 0 : i32
    %c0_i32_1 = arith.constant 0 : i32
    return %arg0, %c0_i32, %c0_i32_0 : i32, i32, i32
  }
}

</mosaic_0001>

<bundles_post_ra>
// kernel: tpu_custom_call.1
= control target key start
LH: loop header
LB: loop body
LE: loop exit
PB: predicated region body
PF: predicated region fallthrough
CT: control target
= control target key end

     0   :  { %6 = vsyncpa [#allocation4], 0  ;;  %s193_s0 = inlined_call_operand.hbm [shape: f32[16,128], index: 0, kind: input, shape index: {}]   ;;  %s194_s1 = inlined_call_operand.hbm [shape: f32[1,8,128], index: 1, kind: output, shape index: {}]  }
   0x1   :  { %7 = vsyncpa [#allocation5], 0  ;;  %s155_s6 = smov [#allocation3]   ;;  %s107_s10 = scalar_lea.hbm %s193_s0, 256 }
   0x2   :  { %s19_s7 = sshll.u32 %s155_s6, 4  ;;  %p108_p0 = scmp.ne.s32.totalorder %s193_s0, %s107_s10  ;;  %s20_s7 = int_to_ptr.vmem [resolvable:$true] %s19_s7 }
   0x3   :  { %p111_p1 = scmp.lt.u32.totalorder %s107_s10, %s193_s0 }
   0x5   :  { %p113_p2 = pnand %p111_p1, %p108_p0 }
   0x7   :  { %116 = shalt.err (!%p113_p2)
}
   0x8   :  { %s117_s15 = scalar_lea.vmem %s20_s7, 256  ;;  %p122_p4 = scmp.lt.s32.totalorder %s20_s7, %s20_s7 }
   0x9   :  { %p118_p3 = scmp.ne.s32.totalorder %s20_s7, %s117_s15  ;;  %p123_p5 = scmp.lt.s32.totalorder %s117_s15, %s117_s15 }
   0xb   :  { %p124_p6 = por %p123_p5, %p122_p4 }
   0xd   :  { %p125_p7 = pnand %p124_p6, %p118_p3 }
   0xf   :  { %128 = shalt.err (!%p125_p7)
}
  0x10   :  { %s156_s16 = smov 128   ;;  %s157_s17 = smov 8  }
  0x11   :  { %25 = dma.hbm_to_vmem [thread:$0]  %s193_s0, 256, %s20_s7, [#allocation4], %s156_s16, %s156_s16, %s157_s17  }
  0x12   :  { %151 = dma.done.wait [#allocation4], 256  }
  0x13   :  { %152 = vsyncadd [#allocation4], 4294967040  ;;  %v49_v0 = vld [vmem:[#allocation3] sm:$0xff]  ;;  %v50_v1 = vld [vmem:[#allocation3 + $0x8] sm:$0xff]  ;;  %s158_s20 = smov [#allocation6]  }
  0x14   :  { %v51_v2 = vsub.f32 1.0, %v49_v0  ;;  %v52_v3 = vsub.f32 1.0, %v50_v1  ;;  %s92_s21 = sshll.u32 %s158_s20, 4  ;;  %s93_s21 = int_to_ptr.vmem [resolvable:$true] %s92_s21 }
  0x15   :  { %s129_s22 = scalar_lea.vmem %s93_s21, 128  ;;  %p134_p9 = scmp.lt.s32.totalorder %s93_s21, %s93_s21 }
  0x16   :  { %v53_v4 = vmul.f32 %v51_v2, %v49_v0  ;;  %v54_v5 = vmul.f32 %v52_v3, %v50_v1  ;;  %p130_p8 = scmp.ne.s32.totalorder %s93_s21, %s129_s22  ;;  %p135_p10 = scmp.lt.s32.totalorder %s129_s22, %s129_s22 }
  0x18   :  { %v56_v6 = vadd.f32 %v54_v5, %v53_v4  ;;  %p136_p11 = por %p135_p10, %p134_p9 }
  0x1a   :  { %85 = vst [vmem:[#allocation6] sm:$0xff] %v56_v6  ;;  %p137_p12 = pnand %p136_p11, %p130_p8 }
  0x1c   :  { %140 = shalt.err (!%p137_p12)
}
  0x1d   :  { %s141_s24 = scalar_lea.hbm %s194_s1, 128 }
  0x1e   :  { %p142_p13 = scmp.ne.s32.totalorder %s194_s1, %s141_s24  ;;  %p145_p0 = scmp.lt.u32.totalorder %s141_s24, %s194_s1 }
  0x20   :  { %p147_p1 = pnand %p145_p0, %p142_p13 }
  0x22   :  { %150 = shalt.err (!%p147_p1)
}
  0x23   :  { %95 = dma.vmem_to_hbm [thread:$0]  %s93_s21, 128, %s194_s1, [#allocation5]  }
  0x24   :  { %153 = dma.done.wait [#allocation5], 128  }
  0x25   :  { %154 = vsyncadd [#allocation5], 4294967168 }
  0x26   :  { %99 = vsyncpa [#allocation4], 1 }
  0x27   :  { %100 = vsyncpa [#allocation5], 1 }

</bundles_post_ra>
